<compile_context>
chip_gen: v5e
topology: v5e:2x2
jax: 0.10.0
libtpu: 0.0.40
codegen_flags: <defaults>
</compile_context>

<pallas_src>
import functools

import jax
import jax.numpy as jnp
import numpy as np
from jax.experimental import pallas as pl
from jax.experimental.pallas import tpu as pltpu

EPS = 1e-5
LAYER_SIZES = [7, 16, 32, 64, 128, 64, 32, 16, 1]   # fc1..fc8
N_BN = 7                                            # bn1..bn7
PAD = 128                                           # lane-aligned feature pad


# --------------------------------------------------------------------------
# Pallas kernel: whole forward pass on one VMEM-resident batch (no grid).
# x_ref : (B, 128) f32        features zero-padded to 128 lanes
# w_ref : (7, 128, 128) bf16  padded fc1..fc7 weights, laid out (in, out)
# p_ref : (16, 128) f32       BN gammas/betas + fc8 weight row + fc8 bias
# o_ref : (B, 1) f32
# --------------------------------------------------------------------------
def mlp_kernel(x_ref, w_ref, p_ref, o_ref):
    h = x_ref[...]                                         # (B, 128) f32
    for i in range(N_BN):                                  # static unroll (7)
        # Linear (bias absorbed by training-mode BN). bf16 operands -> MXU,
        # f32 accumulation.
        h = jnp.dot(h.astype(jnp.bfloat16), w_ref[i],
                    preferred_element_type=jnp.float32)    # (B, 128) f32
        # BatchNorm1d (training mode), single-pass stats + folded scale/shift.
        mean = jnp.mean(h, axis=0, keepdims=True)          # (1, 128)
        ex2 = jnp.mean(h * h, axis=0, keepdims=True)       # (1, 128)
        var = ex2 - mean * mean
        gamma = p_ref[2 * i: 2 * i + 1, :]                 # (1, 128)
        beta = p_ref[2 * i + 1: 2 * i + 2, :]              # (1, 128)
        scale = gamma * jax.lax.rsqrt(var + EPS)
        shift = beta - mean * scale
        # ReLU (padded lanes stay exactly 0: gamma=beta=0 there).
        h = jnp.maximum(h * scale + shift, 0.0)
    # fc8 (16 -> 1): VPU multiply + XLU lane reduce instead of an N=1 matmul.
    w_out = p_ref[2 * N_BN: 2 * N_BN + 1, :]               # (1, 128)
    b_out = p_ref[2 * N_BN + 1: 2 * N_BN + 2, 0:1]         # (1, 1)
    o_ref[...] = (jnp.sum(h * w_out, axis=1, keepdims=True)
                  + b_out).astype(o_ref.dtype)


# --------------------------------------------------------------------------
# Parameter packing (trace-time, numpy)
# --------------------------------------------------------------------------
def pack_params(params):
    """params: list of (w (in,out) f32, b (out,) f32, gamma|None, beta|None)."""
    W = np.zeros((N_BN, PAD, PAD), np.float32)
    P = np.zeros((2 * N_BN + 2, PAD), np.float32)
    for i in range(N_BN):
        w, _b, g, be = params[i]          # bias dropped: absorbed by BN mean
        fin, fout = w.shape
        W[i, :fin, :fout] = np.asarray(w)
        P[2 * i, :fout] = np.asarray(g)
        P[2 * i + 1, :fout] = np.asarray(be)
    w8, b8, _, _ = params[N_BN]
    P[2 * N_BN, : w8.shape[0]] = np.asarray(w8)[:, 0]
    P[2 * N_BN + 1, 0] = float(np.asarray(b8)[0])
    return jnp.asarray(W, jnp.bfloat16), jnp.asarray(P, jnp.float32)


# --------------------------------------------------------------------------
# Wrapper (jit so the feature pad fuses with the kernel dispatch)
# --------------------------------------------------------------------------
@functools.partial(jax.jit, static_argnames=())
def regression_model_latency(x, w_slab, p_slab):
    B, F = x.shape
    x_pad = jnp.pad(x.astype(jnp.float32), ((0, 0), (0, PAD - F)))
    vmem = pl.BlockSpec(memory_space=pltpu.MemorySpace.VMEM)
    return pl.pallas_call(
        mlp_kernel,
        out_shape=jax.ShapeDtypeStruct((B, 1), jnp.float32),
        in_specs=[vmem, vmem, vmem],
        out_specs=vmem,
        compiler_params=pltpu.CompilerParams(vmem_limit_bytes=32 << 20),
    )(x_pad, w_slab, p_slab)


# --------------------------------------------------------------------------
# Deterministic parameter init (PyTorch nn.Linear default: U(-1/sqrt(in), +))
# --------------------------------------------------------------------------
def init_params(key):
    params = []
    for i in range(len(LAYER_SIZES) - 1):
        fin, fout = LAYER_SIZES[i], LAYER_SIZES[i + 1]
        key, kw, kb = jax.random.split(key, 3)
        bound = 1.0 / np.sqrt(fin)
        w = jax.random.uniform(kw, (fin, fout), jnp.float32, -bound, bound)
        b = jax.random.uniform(kb, (fout,), jnp.float32, -bound, bound)
        if i < N_BN:
            gamma = jnp.ones((fout,), jnp.float32)    # BN default affine init
            beta = jnp.zeros((fout,), jnp.float32)
        else:
            gamma = beta = None
        params.append((w, b, gamma, beta))
    return params


# --------------------------------------------------------------------------
# References
# --------------------------------------------------------------------------
def reference_f32(x, params):
    """Faithful f32 PyTorch semantics: Linear(+bias) -> BN(train) -> ReLU."""
    h = x.astype(jnp.float32)
    for i, (w, b, g, be) in enumerate(params):
        h = h @ w + b
        if g is not None:
            mean = jnp.mean(h, axis=0, keepdims=True)
            var = jnp.mean((h - mean) ** 2, axis=0, keepdims=True)
            h = (h - mean) * jax.lax.rsqrt(var + EPS) * g + be
            h = jnp.maximum(h, 0.0)
    return h


def reference_mirror(x, w_slab, p_slab):
    """Same numerics as the kernel (bf16 matmuls, single-pass BN)."""
    h = jnp.pad(x.astype(jnp.float32), ((0, 0), (0, PAD - x.shape[1])))
    for i in range(N_BN):
        h = jnp.dot(h.astype(jnp.bfloat16), w_slab[i],
                    preferred_element_type=jnp.float32)
        mean = jnp.mean(h, axis=0, keepdims=True)
        var = jnp.mean(h * h, axis=0, keepdims=True) - mean * mean
        gamma = p_slab[2 * i: 2 * i + 1]
        beta = p_slab[2 * i + 1: 2 * i + 2]
        scale = gamma * jax.lax.rsqrt(var + EPS)
        h = jnp.maximum(h * scale + (beta - mean * scale), 0.0)
    w8 = p_slab[2 * N_BN: 2 * N_BN + 1]
    b8 = p_slab[2 * N_BN + 1, 0]
    return jnp.sum(h * w8, axis=1, keepdims=True) + b8


if __name__ == "__main__":
    key = jax.random.PRNGKey(0)
    key, kx = jax.random.split(key)
    B = 32
    x = jax.random.normal(kx, (B, 7), jnp.float32)

    params = init_params(key)
    w_slab, p_slab = pack_params(params)

    out = jax.block_until_ready(regression_model_latency(x, w_slab, p_slab))

    # 1) Exact-intent check (same numerics outside Pallas): tight tolerance.
    mirror = jax.block_until_ready(reference_mirror(x, w_slab, p_slab))
    np.testing.assert_allclose(np.asarray(out), np.asarray(mirror),
                               rtol=2e-3, atol=2e-3)

    # 2) PyTorch-semantics f32 reference (with biases, two-pass BN): loose
    #    tolerance to cover bf16 matmul operands.
    ref = jax.block_until_ready(reference_f32(x, params))
    np.testing.assert_allclose(np.asarray(out), np.asarray(ref),
                               rtol=5e-2, atol=5e-2)

    print("KERNEL_OK")
</pallas_src>

<mosaic_0001>
module attributes {stable_mosaic.version = 11 : i64} {
  func.func @mlp_kernel(%arg0: memref<32x128xf32, #tpu.memory_space<vmem>>, %arg1: memref<7x128x128xbf16, #tpu.memory_space<vmem>>, %arg2: memref<16x128xf32, #tpu.memory_space<vmem>>, %arg3: memref<32x1xf32, #tpu.memory_space<vmem>>) attributes {dimension_semantics = [], scalar_prefetch = 0 : i64, scratch_operands = 0 : i64, tpu.core_type = #tpu.core_type<tc>} {
    %c0 = arith.constant 0 : index
    %c0_0 = arith.constant 0 : index
    %0 = vector.load %arg0[%c0, %c0_0] : memref<32x128xf32, #tpu.memory_space<vmem>>, vector<32x128xf32>
    %1 = arith.truncf %0 : vector<32x128xf32> to vector<32x128xbf16>
    %c0_1 = arith.constant 0 : index
    %c0_2 = arith.constant 0 : index
    %c0_3 = arith.constant 0 : index
    %2 = vector.load %arg1[%c0_1, %c0_2, %c0_3] : memref<7x128x128xbf16, #tpu.memory_space<vmem>>, vector<1x128x128xbf16>
    %3 = vector.shape_cast %2 : vector<1x128x128xbf16> to vector<128x128xbf16>
    %cst = arith.constant dense<0.000000e+00> : vector<32x128xf32>
    %4 = tpu.matmul %1, %3, %cst {dimension_numbers = #tpu.dot_dimension_numbers<[1], [0], [0], [1], [0, 0, 1, 1], [], []>} : vector<32x128xbf16>, vector<128x128xbf16>, vector<32x128xf32> -> vector<32x128xf32>
    %cst_4 = arith.constant dense<0.000000e+00> : vector<128xf32>
    %5 = vector.multi_reduction <add>, %4, %cst_4 [0] : vector<32x128xf32> to vector<128xf32>
    %6 = vector.shape_cast %5 : vector<128xf32> to vector<1x128xf32>
    %cst_5 = arith.constant 3.200000e+01 : f32
    %7 = vector.broadcast %cst_5 : f32 to vector<1x128xf32>
    %8 = arith.divf %6, %7 : vector<1x128xf32>
    %9 = arith.mulf %4, %4 : vector<32x128xf32>
    %cst_6 = arith.constant dense<0.000000e+00> : vector<128xf32>
    %10 = vector.multi_reduction <add>, %9, %cst_6 [0] : vector<32x128xf32> to vector<128xf32>
    %11 = vector.shape_cast %10 : vector<128xf32> to vector<1x128xf32>
    %cst_7 = arith.constant 3.200000e+01 : f32
    %12 = vector.broadcast %cst_7 : f32 to vector<1x128xf32>
    %13 = arith.divf %11, %12 : vector<1x128xf32>
    %14 = arith.mulf %8, %8 : vector<1x128xf32>
    %15 = arith.subf %13, %14 : vector<1x128xf32>
    %c0_8 = arith.constant 0 : index
    %c0_9 = arith.constant 0 : index
    %16 = vector.load %arg2[%c0_8, %c0_9] : memref<16x128xf32, #tpu.memory_space<vmem>>, vector<1x128xf32>
    %c1 = arith.constant 1 : index
    %c0_10 = arith.constant 0 : index
    %17 = vector.load %arg2[%c1, %c0_10] : memref<16x128xf32, #tpu.memory_space<vmem>>, vector<1x128xf32>
    %cst_11 = arith.constant 9.99999974E-6 : f32
    %18 = vector.broadcast %cst_11 : f32 to vector<1x128xf32>
    %19 = arith.addf %15, %18 : vector<1x128xf32>
    %20 = math.rsqrt %19 : vector<1x128xf32>
    %21 = arith.mulf %16, %20 : vector<1x128xf32>
    %22 = arith.mulf %8, %21 : vector<1x128xf32>
    %23 = arith.subf %17, %22 : vector<1x128xf32>
    %24 = vector.broadcast %21 : vector<1x128xf32> to vector<32x128xf32>
    %25 = arith.mulf %4, %24 : vector<32x128xf32>
    %26 = vector.broadcast %23 : vector<1x128xf32> to vector<32x128xf32>
    %27 = arith.addf %25, %26 : vector<32x128xf32>
    %cst_12 = arith.constant 0.000000e+00 : f32
    %28 = vector.broadcast %cst_12 : f32 to vector<32x128xf32>
    %29 = arith.maximumf %27, %28 : vector<32x128xf32>
    %30 = arith.truncf %29 : vector<32x128xf32> to vector<32x128xbf16>
    %c1_13 = arith.constant 1 : index
    %c0_14 = arith.constant 0 : index
    %c0_15 = arith.constant 0 : index
    %31 = vector.load %arg1[%c1_13, %c0_14, %c0_15] : memref<7x128x128xbf16, #tpu.memory_space<vmem>>, vector<1x128x128xbf16>
    %32 = vector.shape_cast %31 : vector<1x128x128xbf16> to vector<128x128xbf16>
    %cst_16 = arith.constant dense<0.000000e+00> : vector<32x128xf32>
    %33 = tpu.matmul %30, %32, %cst_16 {dimension_numbers = #tpu.dot_dimension_numbers<[1], [0], [0], [1], [0, 0, 1, 1], [], []>} : vector<32x128xbf16>, vector<128x128xbf16>, vector<32x128xf32> -> vector<32x128xf32>
    %cst_17 = arith.constant dense<0.000000e+00> : vector<128xf32>
    %34 = vector.multi_reduction <add>, %33, %cst_17 [0] : vector<32x128xf32> to vector<128xf32>
    %35 = vector.shape_cast %34 : vector<128xf32> to vector<1x128xf32>
    %cst_18 = arith.constant 3.200000e+01 : f32
    %36 = vector.broadcast %cst_18 : f32 to vector<1x128xf32>
    %37 = arith.divf %35, %36 : vector<1x128xf32>
    %38 = arith.mulf %33, %33 : vector<32x128xf32>
    %cst_19 = arith.constant dense<0.000000e+00> : vector<128xf32>
    %39 = vector.multi_reduction <add>, %38, %cst_19 [0] : vector<32x128xf32> to vector<128xf32>
    %40 = vector.shape_cast %39 : vector<128xf32> to vector<1x128xf32>
    %cst_20 = arith.constant 3.200000e+01 : f32
    %41 = vector.broadcast %cst_20 : f32 to vector<1x128xf32>
    %42 = arith.divf %40, %41 : vector<1x128xf32>
    %43 = arith.mulf %37, %37 : vector<1x128xf32>
    %44 = arith.subf %42, %43 : vector<1x128xf32>
    %c2 = arith.constant 2 : index
    %c0_21 = arith.constant 0 : index
    %45 = vector.load %arg2[%c2, %c0_21] : memref<16x128xf32, #tpu.memory_space<vmem>>, vector<1x128xf32>
    %c3 = arith.constant 3 : index
    %c0_22 = arith.constant 0 : index
    %46 = vector.load %arg2[%c3, %c0_22] : memref<16x128xf32, #tpu.memory_space<vmem>>, vector<1x128xf32>
    %cst_23 = arith.constant 9.99999974E-6 : f32
    %47 = vector.broadcast %cst_23 : f32 to vector<1x128xf32>
    %48 = arith.addf %44, %47 : vector<1x128xf32>
    %49 = math.rsqrt %48 : vector<1x128xf32>
    %50 = arith.mulf %45, %49 : vector<1x128xf32>
    %51 = arith.mulf %37, %50 : vector<1x128xf32>
    %52 = arith.subf %46, %51 : vector<1x128xf32>
    %53 = vector.broadcast %50 : vector<1x128xf32> to vector<32x128xf32>
    %54 = arith.mulf %33, %53 : vector<32x128xf32>
    %55 = vector.broadcast %52 : vector<1x128xf32> to vector<32x128xf32>
    %56 = arith.addf %54, %55 : vector<32x128xf32>
    %cst_24 = arith.constant 0.000000e+00 : f32
    %57 = vector.broadcast %cst_24 : f32 to vector<32x128xf32>
    %58 = arith.maximumf %56, %57 : vector<32x128xf32>
    %59 = arith.truncf %58 : vector<32x128xf32> to vector<32x128xbf16>
    %c2_25 = arith.constant 2 : index
    %c0_26 = arith.constant 0 : index
    %c0_27 = arith.constant 0 : index
    %60 = vector.load %arg1[%c2_25, %c0_26, %c0_27] : memref<7x128x128xbf16, #tpu.memory_space<vmem>>, vector<1x128x128xbf16>
    %61 = vector.shape_cast %60 : vector<1x128x128xbf16> to vector<128x128xbf16>
    %cst_28 = arith.constant dense<0.000000e+00> : vector<32x128xf32>
    %62 = tpu.matmul %59, %61, %cst_28 {dimension_numbers = #tpu.dot_dimension_numbers<[1], [0], [0], [1], [0, 0, 1, 1], [], []>} : vector<32x128xbf16>, vector<128x128xbf16>, vector<32x128xf32> -> vector<32x128xf32>
    %cst_29 = arith.constant dense<0.000000e+00> : vector<128xf32>
    %63 = vector.multi_reduction <add>, %62, %cst_29 [0] : vector<32x128xf32> to vector<128xf32>
    %64 = vector.shape_cast %63 : vector<128xf32> to vector<1x128xf32>
    %cst_30 = arith.constant 3.200000e+01 : f32
    %65 = vector.broadcast %cst_30 : f32 to vector<1x128xf32>
    %66 = arith.divf %64, %65 : vector<1x128xf32>
    %67 = arith.mulf %62, %62 : vector<32x128xf32>
    %cst_31 = arith.constant dense<0.000000e+00> : vector<128xf32>
    %68 = vector.multi_reduction <add>, %67, %cst_31 [0] : vector<32x128xf32> to vector<128xf32>
    %69 = vector.shape_cast %68 : vector<128xf32> to vector<1x128xf32>
    %cst_32 = arith.constant 3.200000e+01 : f32
    %70 = vector.broadcast %cst_32 : f32 to vector<1x128xf32>
    %71 = arith.divf %69, %70 : vector<1x128xf32>
    %72 = arith.mulf %66, %66 : vector<1x128xf32>
    %73 = arith.subf %71, %72 : vector<1x128xf32>
    %c4 = arith.constant 4 : index
    %c0_33 = arith.constant 0 : index
    %74 = vector.load %arg2[%c4, %c0_33] : memref<16x128xf32, #tpu.memory_space<vmem>>, vector<1x128xf32>
    %c5 = arith.constant 5 : index
    %c0_34 = arith.constant 0 : index
    %75 = vector.load %arg2[%c5, %c0_34] : memref<16x128xf32, #tpu.memory_space<vmem>>, vector<1x128xf32>
    %cst_35 = arith.constant 9.99999974E-6 : f32
    %76 = vector.broadcast %cst_35 : f32 to vector<1x128xf32>
    %77 = arith.addf %73, %76 : vector<1x128xf32>
    %78 = math.rsqrt %77 : vector<1x128xf32>
    %79 = arith.mulf %74, %78 : vector<1x128xf32>
    %80 = arith.mulf %66, %79 : vector<1x128xf32>
    %81 = arith.subf %75, %80 : vector<1x128xf32>
    %82 = vector.broadcast %79 : vector<1x128xf32> to vector<32x128xf32>
    %83 = arith.mulf %62, %82 : vector<32x128xf32>
    %84 = vector.broadcast %81 : vector<1x128xf32> to vector<32x128xf32>
    %85 = arith.addf %83, %84 : vector<32x128xf32>
    %cst_36 = arith.constant 0.000000e+00 : f32
    %86 = vector.broadcast %cst_36 : f32 to vector<32x128xf32>
    %87 = arith.maximumf %85, %86 : vector<32x128xf32>
    %88 = arith.truncf %87 : vector<32x128xf32> to vector<32x128xbf16>
    %c3_37 = arith.constant 3 : index
    %c0_38 = arith.constant 0 : index
    %c0_39 = arith.constant 0 : index
    %89 = vector.load %arg1[%c3_37, %c0_38, %c0_39] : memref<7x128x128xbf16, #tpu.memory_space<vmem>>, vector<1x128x128xbf16>
    %90 = vector.shape_cast %89 : vector<1x128x128xbf16> to vector<128x128xbf16>
    %cst_40 = arith.constant dense<0.000000e+00> : vector<32x128xf32>
    %91 = tpu.matmul %88, %90, %cst_40 {dimension_numbers = #tpu.dot_dimension_numbers<[1], [0], [0], [1], [0, 0, 1, 1], [], []>} : vector<32x128xbf16>, vector<128x128xbf16>, vector<32x128xf32> -> vector<32x128xf32>
    %cst_41 = arith.constant dense<0.000000e+00> : vector<128xf32>
    %92 = vector.multi_reduction <add>, %91, %cst_41 [0] : vector<32x128xf32> to vector<128xf32>
    %93 = vector.shape_cast %92 : vector<128xf32> to vector<1x128xf32>
    %cst_42 = arith.constant 3.200000e+01 : f32
    %94 = vector.broadcast %cst_42 : f32 to vector<1x128xf32>
    %95 = arith.divf %93, %94 : vector<1x128xf32>
    %96 = arith.mulf %91, %91 : vector<32x128xf32>
    %cst_43 = arith.constant dense<0.000000e+00> : vector<128xf32>
    %97 = vector.multi_reduction <add>, %96, %cst_43 [0] : vector<32x128xf32> to vector<128xf32>
    %98 = vector.shape_cast %97 : vector<128xf32> to vector<1x128xf32>
    %cst_44 = arith.constant 3.200000e+01 : f32
    %99 = vector.broadcast %cst_44 : f32 to vector<1x128xf32>
    %100 = arith.divf %98, %99 : vector<1x128xf32>
    %101 = arith.mulf %95, %95 : vector<1x128xf32>
    %102 = arith.subf %100, %101 : vector<1x128xf32>
    %c6 = arith.constant 6 : index
    %c0_45 = arith.constant 0 : index
    %103 = vector.load %arg2[%c6, %c0_45] : memref<16x128xf32, #tpu.memory_space<vmem>>, vector<1x128xf32>
    %c7 = arith.constant 7 : index
    %c0_46 = arith.constant 0 : index
    %104 = vector.load %arg2[%c7, %c0_46] : memref<16x128xf32, #tpu.memory_space<vmem>>, vector<1x128xf32>
    %cst_47 = arith.constant 9.99999974E-6 : f32
    %105 = vector.broadcast %cst_47 : f32 to vector<1x128xf32>
    %106 = arith.addf %102, %105 : vector<1x128xf32>
    %107 = math.rsqrt %106 : vector<1x128xf32>
    %108 = arith.mulf %103, %107 : vector<1x128xf32>
    %109 = arith.mulf %95, %108 : vector<1x128xf32>
    %110 = arith.subf %104, %109 : vector<1x128xf32>
    %111 = vector.broadcast %108 : vector<1x128xf32> to vector<32x128xf32>
    %112 = arith.mulf %91, %111 : vector<32x128xf32>
    %113 = vector.broadcast %110 : vector<1x128xf32> to vector<32x128xf32>
    %114 = arith.addf %112, %113 : vector<32x128xf32>
    %cst_48 = arith.constant 0.000000e+00 : f32
    %115 = vector.broadcast %cst_48 : f32 to vector<32x128xf32>
    %116 = arith.maximumf %114, %115 : vector<32x128xf32>
    %117 = arith.truncf %116 : vector<32x128xf32> to vector<32x128xbf16>
    %c4_49 = arith.constant 4 : index
    %c0_50 = arith.constant 0 : index
    %c0_51 = arith.constant 0 : index
    %118 = vector.load %arg1[%c4_49, %c0_50, %c0_51] : memref<7x128x128xbf16, #tpu.memory_space<vmem>>, vector<1x128x128xbf16>
    %119 = vector.shape_cast %118 : vector<1x128x128xbf16> to vector<128x128xbf16>
    %cst_52 = arith.constant dense<0.000000e+00> : vector<32x128xf32>
    %120 = tpu.matmul %117, %119, %cst_52 {dimension_numbers = #tpu.dot_dimension_numbers<[1], [0], [0], [1], [0, 0, 1, 1], [], []>} : vector<32x128xbf16>, vector<128x128xbf16>, vector<32x128xf32> -> vector<32x128xf32>
    %cst_53 = arith.constant dense<0.000000e+00> : vector<128xf32>
    %121 = vector.multi_reduction <add>, %120, %cst_53 [0] : vector<32x128xf32> to vector<128xf32>
    %122 = vector.shape_cast %121 : vector<128xf32> to vector<1x128xf32>
    %cst_54 = arith.constant 3.200000e+01 : f32
    %123 = vector.broadcast %cst_54 : f32 to vector<1x128xf32>
    %124 = arith.divf %122, %123 : vector<1x128xf32>
    %125 = arith.mulf %120, %120 : vector<32x128xf32>
    %cst_55 = arith.constant dense<0.000000e+00> : vector<128xf32>
    %126 = vector.multi_reduction <add>, %125, %cst_55 [0] : vector<32x128xf32> to vector<128xf32>
    %127 = vector.shape_cast %126 : vector<128xf32> to vector<1x128xf32>
    %cst_56 = arith.constant 3.200000e+01 : f32
    %128 = vector.broadcast %cst_56 : f32 to vector<1x128xf32>
    %129 = arith.divf %127, %128 : vector<1x128xf32>
    %130 = arith.mulf %124, %124 : vector<1x128xf32>
    %131 = arith.subf %129, %130 : vector<1x128xf32>
    %c8 = arith.constant 8 : index
    %c0_57 = arith.constant 0 : index
    %132 = vector.load %arg2[%c8, %c0_57] : memref<16x128xf32, #tpu.memory_space<vmem>>, vector<1x128xf32>
    %c9 = arith.constant 9 : index
    %c0_58 = arith.constant 0 : index
    %133 = vector.load %arg2[%c9, %c0_58] : memref<16x128xf32, #tpu.memory_space<vmem>>, vector<1x128xf32>
    %cst_59 = arith.constant 9.99999974E-6 : f32
    %134 = vector.broadcast %cst_59 : f32 to vector<1x128xf32>
    %135 = arith.addf %131, %134 : vector<1x128xf32>
    %136 = math.rsqrt %135 : vector<1x128xf32>
    %137 = arith.mulf %132, %136 : vector<1x128xf32>
    %138 = arith.mulf %124, %137 : vector<1x128xf32>
    %139 = arith.subf %133, %138 : vector<1x128xf32>
    %140 = vector.broadcast %137 : vector<1x128xf32> to vector<32x128xf32>
    %141 = arith.mulf %120, %140 : vector<32x128xf32>
    %142 = vector.broadcast %139 : vector<1x128xf32> to vector<32x128xf32>
    %143 = arith.addf %141, %142 : vector<32x128xf32>
    %cst_60 = arith.constant 0.000000e+00 : f32
    %144 = vector.broadcast %cst_60 : f32 to vector<32x128xf32>
    %145 = arith.maximumf %143, %144 : vector<32x128xf32>
    %146 = arith.truncf %145 : vector<32x128xf32> to vector<32x128xbf16>
    %c5_61 = arith.constant 5 : index
    %c0_62 = arith.constant 0 : index
    %c0_63 = arith.constant 0 : index
    %147 = vector.load %arg1[%c5_61, %c0_62, %c0_63] : memref<7x128x128xbf16, #tpu.memory_space<vmem>>, vector<1x128x128xbf16>
    %148 = vector.shape_cast %147 : vector<1x128x128xbf16> to vector<128x128xbf16>
    %cst_64 = arith.constant dense<0.000000e+00> : vector<32x128xf32>
    %149 = tpu.matmul %146, %148, %cst_64 {dimension_numbers = #tpu.dot_dimension_numbers<[1], [0], [0], [1], [0, 0, 1, 1], [], []>} : vector<32x128xbf16>, vector<128x128xbf16>, vector<32x128xf32> -> vector<32x128xf32>
    %cst_65 = arith.constant dense<0.000000e+00> : vector<128xf32>
    %150 = vector.multi_reduction <add>, %149, %cst_65 [0] : vector<32x128xf32> to vector<128xf32>
    %151 = vector.shape_cast %150 : vector<128xf32> to vector<1x128xf32>
    %cst_66 = arith.constant 3.200000e+01 : f32
    %152 = vector.broadcast %cst_66 : f32 to vector<1x128xf32>
    %153 = arith.divf %151, %152 : vector<1x128xf32>
    %154 = arith.mulf %149, %149 : vector<32x128xf32>
    %cst_67 = arith.constant dense<0.000000e+00> : vector<128xf32>
    %155 = vector.multi_reduction <add>, %154, %cst_67 [0] : vector<32x128xf32> to vector<128xf32>
    %156 = vector.shape_cast %155 : vector<128xf32> to vector<1x128xf32>
    %cst_68 = arith.constant 3.200000e+01 : f32
    %157 = vector.broadcast %cst_68 : f32 to vector<1x128xf32>
    %158 = arith.divf %156, %157 : vector<1x128xf32>
    %159 = arith.mulf %153, %153 : vector<1x128xf32>
    %160 = arith.subf %158, %159 : vector<1x128xf32>
    %c10 = arith.constant 10 : index
    %c0_69 = arith.constant 0 : index
    %161 = vector.load %arg2[%c10, %c0_69] : memref<16x128xf32, #tpu.memory_space<vmem>>, vector<1x128xf32>
    %c11 = arith.constant 11 : index
    %c0_70 = arith.constant 0 : index
    %162 = vector.load %arg2[%c11, %c0_70] : memref<16x128xf32, #tpu.memory_space<vmem>>, vector<1x128xf32>
    %cst_71 = arith.constant 9.99999974E-6 : f32
    %163 = vector.broadcast %cst_71 : f32 to vector<1x128xf32>
    %164 = arith.addf %160, %163 : vector<1x128xf32>
    %165 = math.rsqrt %164 : vector<1x128xf32>
    %166 = arith.mulf %161, %165 : vector<1x128xf32>
    %167 = arith.mulf %153, %166 : vector<1x128xf32>
    %168 = arith.subf %162, %167 : vector<1x128xf32>
    %169 = vector.broadcast %166 : vector<1x128xf32> to vector<32x128xf32>
    %170 = arith.mulf %149, %169 : vector<32x128xf32>
    %171 = vector.broadcast %168 : vector<1x128xf32> to vector<32x128xf32>
    %172 = arith.addf %170, %171 : vector<32x128xf32>
    %cst_72 = arith.constant 0.000000e+00 : f32
    %173 = vector.broadcast %cst_72 : f32 to vector<32x128xf32>
    %174 = arith.maximumf %172, %173 : vector<32x128xf32>
    %175 = arith.truncf %174 : vector<32x128xf32> to vector<32x128xbf16>
    %c6_73 = arith.constant 6 : index
    %c0_74 = arith.constant 0 : index
    %c0_75 = arith.constant 0 : index
    %176 = vector.load %arg1[%c6_73, %c0_74, %c0_75] : memref<7x128x128xbf16, #tpu.memory_space<vmem>>, vector<1x128x128xbf16>
    %177 = vector.shape_cast %176 : vector<1x128x128xbf16> to vector<128x128xbf16>
    %cst_76 = arith.constant dense<0.000000e+00> : vector<32x128xf32>
    %178 = tpu.matmul %175, %177, %cst_76 {dimension_numbers = #tpu.dot_dimension_numbers<[1], [0], [0], [1], [0, 0, 1, 1], [], []>} : vector<32x128xbf16>, vector<128x128xbf16>, vector<32x128xf32> -> vector<32x128xf32>
    %cst_77 = arith.constant dense<0.000000e+00> : vector<128xf32>
    %179 = vector.multi_reduction <add>, %178, %cst_77 [0] : vector<32x128xf32> to vector<128xf32>
    %180 = vector.shape_cast %179 : vector<128xf32> to vector<1x128xf32>
    %cst_78 = arith.constant 3.200000e+01 : f32
    %181 = vector.broadcast %cst_78 : f32 to vector<1x128xf32>
    %182 = arith.divf %180, %181 : vector<1x128xf32>
    %183 = arith.mulf %178, %178 : vector<32x128xf32>
    %cst_79 = arith.constant dense<0.000000e+00> : vector<128xf32>
    %184 = vector.multi_reduction <add>, %183, %cst_79 [0] : vector<32x128xf32> to vector<128xf32>
    %185 = vector.shape_cast %184 : vector<128xf32> to vector<1x128xf32>
    %cst_80 = arith.constant 3.200000e+01 : f32
    %186 = vector.broadcast %cst_80 : f32 to vector<1x128xf32>
    %187 = arith.divf %185, %186 : vector<1x128xf32>
    %188 = arith.mulf %182, %182 : vector<1x128xf32>
    %189 = arith.subf %187, %188 : vector<1x128xf32>
    %c12 = arith.constant 12 : index
    %c0_81 = arith.constant 0 : index
    %190 = vector.load %arg2[%c12, %c0_81] : memref<16x128xf32, #tpu.memory_space<vmem>>, vector<1x128xf32>
    %c13 = arith.constant 13 : index
    %c0_82 = arith.constant 0 : index
    %191 = vector.load %arg2[%c13, %c0_82] : memref<16x128xf32, #tpu.memory_space<vmem>>, vector<1x128xf32>
    %cst_83 = arith.constant 9.99999974E-6 : f32
    %192 = vector.broadcast %cst_83 : f32 to vector<1x128xf32>
    %193 = arith.addf %189, %192 : vector<1x128xf32>
    %194 = math.rsqrt %193 : vector<1x128xf32>
    %195 = arith.mulf %190, %194 : vector<1x128xf32>
    %196 = arith.mulf %182, %195 : vector<1x128xf32>
    %197 = arith.subf %191, %196 : vector<1x128xf32>
    %198 = vector.broadcast %195 : vector<1x128xf32> to vector<32x128xf32>
    %199 = arith.mulf %178, %198 : vector<32x128xf32>
    %200 = vector.broadcast %197 : vector<1x128xf32> to vector<32x128xf32>
    %201 = arith.addf %199, %200 : vector<32x128xf32>
    %cst_84 = arith.constant 0.000000e+00 : f32
    %202 = vector.broadcast %cst_84 : f32 to vector<32x128xf32>
    %203 = arith.maximumf %201, %202 : vector<32x128xf32>
    %c14 = arith.constant 14 : index
    %c0_85 = arith.constant 0 : index
    %204 = vector.load %arg2[%c14, %c0_85] : memref<16x128xf32, #tpu.memory_space<vmem>>, vector<1x128xf32>
    %c15 = arith.constant 15 : index
    %c0_86 = arith.constant 0 : index
    %205 = vector.load %arg2[%c15, %c0_86] : memref<16x128xf32, #tpu.memory_space<vmem>>, vector<1x1xf32>
    %206 = vector.broadcast %204 : vector<1x128xf32> to vector<32x128xf32>
    %207 = arith.mulf %203, %206 : vector<32x128xf32>
    %cst_87 = arith.constant dense<0.000000e+00> : vector<32xf32>
    %208 = vector.multi_reduction <add>, %207, %cst_87 [1] : vector<32x128xf32> to vector<32xf32>
    %209 = vector.shape_cast %208 : vector<32xf32> to vector<32x1xf32>
    %210 = vector.broadcast %205 : vector<1x1xf32> to vector<32x1xf32>
    %211 = arith.addf %209, %210 : vector<32x1xf32>
    %c0_88 = arith.constant 0 : index
    %c0_89 = arith.constant 0 : index
    %212 = vector.load %arg3[%c0_88, %c0_89] : memref<32x1xf32, #tpu.memory_space<vmem>>, vector<32x1xf32>
    tpu.vector_store %arg3[%c0_88, %c0_89], %211 {strides = array<i32>} : memref<32x1xf32, #tpu.memory_space<vmem>>, vector<32x1xf32>,
    return
  }
}

</mosaic_0001>

<bundles_post_ra>
// kernel: regression_model_latency.1
= control target key start
LH: loop header
LB: loop body
LE: loop exit
PB: predicated region body
PF: predicated region fallthrough
CT: control target
= control target key end

     0   :  { %8 = vsyncpa [#allocation3], 0  ;;  %s1400_s15 = smov [#allocation2]   ;;  %s1401_s17 = smov 64   ;;  %s1623_s0 = inlined_call_operand.vmem [shape: f32[32,128], index: 0, kind: input, shape index: {}]   ;;  %s1624_s1 = inlined_call_operand.hbm [shape: bf16[7,128,128], index: 1, kind: input, shape index: {}]   ;;  %s1625_s2 = inlined_call_operand.vmem [shape: f32[16,128], index: 2, kind: input, shape index: {}]   ;;  %s1626_s3 = inlined_call_operand.vmem [shape: f32[32,1], index: 3, kind: output, shape index: {}]  }
   0x1   :  { %s15_s14 = sshll.u32 %s1624_s1, 4  ;;  %s17_s16 = sshll.u32 %s1400_s15, 4  ;;  %s16_s14 = int_to_ptr.hbm [resolvable:$true] %s15_s14  ;;  %s18_s16 = int_to_ptr.vmem [resolvable:$true] %s17_s16 }
   0x2   :  { %s1402_s18 = smov 4  }
   0x3   :  { %23 = dma.hbm_to_vmem [thread:$0]  %s16_s14, 7168, %s18_s16, [#allocation3], %s1401_s17, %s1401_s17, %s1402_s18  }
   0x4   :  { %1398 = dma.done.wait [#allocation3], 7168  }
   0x5   :  { %1399 = vsyncadd [#allocation3], 4294960128  ;;  %v1295_v0 = vld [vmem:[#allocation2 + $0x38] sm:$0xff]  ;;  %v1294_v1 = vld [vmem:[#allocation2 + $0x30] sm:$0xff]  ;;  %v1403_v16 = vmov 32.0  }
   0x6   :  { %100 = vmatpush.bf16.msra.mxu0 %v1295_v0  ;;  %v1293_v2 = vld [vmem:[#allocation2 + $0x28] sm:$0xff]  ;;  %v1292_v3 = vld [vmem:[#allocation2 + $0x20] sm:$0xff]  ;;  %v1291_v4 = vld [vmem:[#allocation2 + $0x18] sm:$0xff]  ;;  %1358 = vrcp.f32 %v1403_v16 }
   0x7   :  { %v1290_v5 = vld [vmem:[#allocation2 + $0x10] sm:$0xff]  ;;  %v1289_v6 = vld [vmem:[#allocation2 + $0x8] sm:$0xff]  ;;  %v1288_v7 = vld [vmem:[#allocation2] sm:$0xff] }
   0x8   :  { %v30_v8 = vld [vmem:[%s1623_s0] sm:$0xff]  ;;  %v31_v9 = vld [vmem:[%s1623_s0 + $0x8] sm:$0xff]  ;;  %v32_v11 = vld [vmem:[%s1623_s0 + $0x10] sm:$0xff] }
   0x9   :  { %v34_v10 = vpack.c.bf16 %v31_v9, %v30_v8  ;;  %v33_v12 = vld [vmem:[%s1623_s0 + $0x18] sm:$0xff]  ;;  %v1302_v20 = vld [vmem:[#allocation2 + $0x70] sm:$0xff]  ;;  %v1301_v26 = vld [vmem:[#allocation2 + $0x68] sm:$0xff] }
   0xa   :  { %101 = vmatpush.bf16.msra.mxu0 %v1294_v1  ;;  %v35_v13 = vpack.c.bf16 %v33_v12, %v32_v11  ;;  %v1303_v17 = vld [vmem:[#allocation2 + $0x78] sm:$0xff]  ;;  %v1300_v34 = vld [vmem:[#allocation2 + $0x60] sm:$0xff]  ;;  %v1298_v46 = vld [vmem:[#allocation2 + $0x50] sm:$0xff] }
   0xb   :  { %249 = vmatpush.bf16.msra.mxu1 %v1303_v17  ;;  %v1299_v40 = vld [vmem:[#allocation2 + $0x58] sm:$0xff]  ;;  %v1297_v52 = vld [vmem:[#allocation2 + $0x48] sm:$0xff]  ;;  %v1296_v55 = vld [vmem:[#allocation2 + $0x40] sm:$0xff] }
   0xc   :  { %v1359_v19 = vpop.eup %1358  ;;  %v152_v1 = vld [vmem:[%s1625_s2] sm:$0x1] }
   0xd   :  { %v129_v22 = vmul.f32 32.0, %v1359_v19  ;;  %vm133_vm0 = vweird.f32 %v1359_v19 }
   0xe   :  { %102 = vmatpush.bf16.msra.mxu0 %v1293_v2 }
   0xf   :  { %250 = vmatpush.bf16.msra.mxu1 %v1302_v20  ;;  %v130_v30 = vsub.f32 1.0, %v129_v22 }
  0x11   :  { %v131_v37 = vmul.f32 %v1359_v19, %v130_v30 }
  0x12   :  { %103 = vmatpush.bf16.msra.mxu0 %v1292_v3 }
  0x13   :  { %251 = vmatpush.bf16.msra.mxu1 %v1301_v26  ;;  %v132_v43 = vadd.f32 %v1359_v19, %v131_v37 }
  0x15   :  { %v1459_v49 = vsel %vm133_vm0, %v1359_v19, %v132_v43 }
  0x16   :  { %104 = vmatpush.bf16.msra.mxu0 %v1291_v4 }
  0x17   :  { %252 = vmatpush.bf16.msra.mxu1 %v1300_v34 }
  0x1a   :  { %105 = vmatpush.bf16.msra.mxu0 %v1290_v5  ;;  %v153_v5 = vld [vmem:[%s1625_s2 + $0x1] sm:$0x1] }
  0x1b   :  { %253 = vmatpush.bf16.msra.mxu1 %v1299_v40 }
  0x1e   :  { %106 = vmatpush.bf16.msra.mxu0 %v1289_v6 }
  0x1f   :  { %254 = vmatpush.bf16.msra.mxu1 %v1298_v46 }
  0x22   :  { %107 = vmatpush.bf16.msra.mxu0 %v1288_v7 }
  0x23   :  { %255 = vmatpush.bf16.msra.mxu1 %v1297_v52 }
  0x25   :  { %108 = vmatmul.bf16.vlgmr.msra.gmra.mxu0 %v34_v10 }
  0x27   :  { %256 = vmatpush.bf16.msra.mxu1 %v1296_v55 }
  0x35   :  { %113 = vmatmul.bf16.gmra.mxu0 %v35_v13 }
  0xa2   :  { %v1439_v14 = vpop.f32.mrf.mxu0 }
  0xa3   :  { %v136_v23 = vmul.f32 %v1439_v14, %v1439_v14 }
  0xaa   :  { %v1441_v15 = vpop.f32.mrf.mxu0 }
  0xab   :  { %v137_v21 = vmul.f32 %v1441_v15, %v1441_v15  ;;  %v119_v24 = vadd.f32 %v1441_v15, %v1439_v14 }
  0xad   :  { %v140_v27 = vadd.f32 %v137_v21, %v136_v23 }
  0xb2   :  { %v1443_v18 = vpop.f32.mrf.mxu0 }
  0xb3   :  { %v138_v25 = vmul.f32 %v1443_v18, %v1443_v18  ;;  %v120_v28 = vadd.f32 %v119_v24, %v1443_v18 }
  0xb5   :  { %v141_v31 = vadd.f32 %v140_v27, %v138_v25  ;;  %v1311_v27 = vld [vmem:[#allocation2 + $0xb8] sm:$0xff] }
  0xb6   :  { %391 = vmatpush.bf16.msra.mxu2 %v1311_v27 }
  0xba   :  { %v1454_v29 = vpop.f32.mrf.mxu0 }
  0xbb   :  { %v121_v32 = vadd.f32 %v120_v28, %v1454_v29  ;;  %v139_v33 = vmul.f32 %v1454_v29, %v1454_v29 }
  0xbd   :  { %v122_v35 = vrot.slane %v121_v32, 4  ;;  %v142_v36 = vadd.f32 %v141_v31, %v139_v33 }
  0xbf   :  { %v123_v38 = vadd.f32 %v122_v35, %v121_v32  ;;  %v143_v39 = vrot.slane %v142_v36, 4  ;;  %v1309_v35 = vld [vmem:[#allocation2 + $0xa8] sm:$0xff] }
  0xc1   :  { %v124_v41 = vrot.slane %v123_v38, 2  ;;  %v144_v42 = vadd.f32 %v143_v39, %v142_v36 }
  0xc3   :  { %v125_v44 = vadd.f32 %v124_v41, %v123_v38  ;;  %v145_v45 = vrot.slane %v144_v42, 2 }
  0xc5   :  { %v126_v47 = vrot.slane %v125_v44, 1  ;;  %v146_v48 = vadd.f32 %v145_v45, %v144_v42  ;;  %v1308_v42 = vld [vmem:[#allocation2 + $0xa0] sm:$0xff] }
  0xc7   :  { %v127_v50 = vadd.f32 %v126_v47, %v125_v44  ;;  %v147_v51 = vrot.slane %v146_v48, 1  ;;  %v1307_v47 = vld [vmem:[#allocation2 + $0x98] sm:$0xff] }
  0xc9   :  { %v135_v53 = vmul.f32 %v1459_v49, %v127_v50  ;;  %v148_v54 = vadd.f32 %v147_v51, %v146_v48 }
  0xcb   :  { %v149_v56 = vmul.f32 %v148_v54, %v1459_v49  ;;  %v150_v57 = vmul.f32 %v135_v53, %v135_v53 }
  0xcd   :  { %v151_v58 = vsub.f32 %v149_v56, %v150_v57  ;;  %v1305_v56 = vld [vmem:[#allocation2 + $0x88] sm:$0xff] }
  0xcf   :  { %v154_v59 = vadd.f32 1e-05, %v151_v58 }
  0xd1   :  { %1360 = vrsqrt.f32 %v154_v59  ;;  %vm161_vm2 = vweird.f32 %v154_v59 }
  0xd7   :  { %v1361_v60 = vpop.eup %1360 }
  0xd8   :  { %v156_v61 = vmul.f32 %v1361_v60, %v154_v59  ;;  %vm162_vm1 = vweird.f32 %v1361_v60 }
  0xd9   :  { %vm163_vm3 = vmor %vm161_vm2, %vm162_vm1 }
  0xda   :  { %v157_v62 = vmul.f32 %v1361_v60, %v156_v61  ;;  %v1304_v61 = vld [vmem:[#allocation2 + $0x80] sm:$0xff] }
  0xdc   :  { %v158_v63 = vmul.f32 0.5, %v157_v62 }
  0xde   :  { %v159_v0 = vsub.f32 1.5, %v158_v63 }
  0xe0   :  { %v160_v2 = vmul.f32 %v1361_v60, %v159_v0 }
  0xe2   :  { %v164_v3 = vsel %vm163_vm3, %v1361_v60, %v160_v2 }
  0xe3   :  { %v165_v4 = vmul.f32 %v164_v3, %v152_v1 }
  0xe5   :  { %v166_v6 = vmul.f32 %v165_v4, %v135_v53  ;;  %v168_v7 = vperm.slane %v165_v4, 0  ;;  %v1306_v53 = vld [vmem:[#allocation2 + $0x90] sm:$0xff] }
  0xe7   :  { %v167_v8 = vsub.f32 %v153_v5, %v166_v6  ;;  %v169_v9 = vmul.f32 %v168_v7, %v1439_v14  ;;  %v170_v10 = vmul.f32 %v168_v7, %v1441_v15  ;;  %v172_v20 = vmul.f32 %v168_v7, %v1454_v29  ;;  %v1310_v29 = vld [vmem:[#allocation2 + $0xb0] sm:$0xff]  ;;  %v294_v5 = vld [vmem:[%s1625_s2 + $0x2] sm:$0x1] }
  0xe8   :  { %v171_v21 = vmul.f32 %v168_v7, %v1443_v18  ;;  %392 = vmatpush.bf16.msra.mxu2 %v1310_v29 }
  0xe9   :  { %v173_v11 = vperm.slane %v167_v8, 0 }
  0xeb   :  { %v174_v12 = vadd.f32 %v173_v11, %v169_v9  ;;  %v175_v13 = vadd.f32 %v173_v11, %v170_v10  ;;  %v176_v22 = vadd.f32 %v173_v11, %v171_v21  ;;  %v177_v23 = vadd.f32 %v173_v11, %v172_v20  ;;  %v295_v9 = vld [vmem:[%s1625_s2 + $0x3] sm:$0x1] }
  0xec   :  { %393 = vmatpush.bf16.msra.mxu2 %v1309_v35 }
  0xed   :  { %v178_v16 = vmax.f32 %v174_v12, 0.0  ;;  %v179_v17 = vmax.f32 %v175_v13, 0.0  ;;  %v180_v24 = vmax.f32 %v176_v22, 0.0  ;;  %v181_v25 = vmax.f32 %v177_v23, 0.0 }
  0xef   :  { %v182_v19 = vpack.c.bf16 %v179_v17, %v178_v16  ;;  %v183_v26 = vpack.c.bf16 %v181_v25, %v180_v24 }
  0xf0   :  { %394 = vmatpush.bf16.msra.mxu2 %v1308_v42 }
  0xf1   :  { %257 = vmatmul.bf16.vlgmr.msra.gmra.mxu1 %v182_v19 }
  0xf4   :  { %395 = vmatpush.bf16.msra.mxu2 %v1307_v47 }
  0xf8   :  { %396 = vmatpush.bf16.msra.mxu2 %v1306_v53 }
  0xfc   :  { %397 = vmatpush.bf16.msra.mxu2 %v1305_v56 }
 0x100   :  { %398 = vmatpush.bf16.msra.mxu2 %v1304_v61 }
 0x101   :  { %262 = vmatmul.bf16.gmra.mxu1 %v183_v26 }
 0x16e   :  { %v1473_v14 = vpop.f32.mrf.mxu1 }
 0x16f   :  { %v278_v18 = vmul.f32 %v1473_v14, %v1473_v14 }
 0x176   :  { %v1475_v15 = vpop.f32.mrf.mxu1 }
 0x177   :  { %v279_v30 = vmul.f32 %v1475_v15, %v1475_v15  ;;  %v268_v31 = vadd.f32 %v1475_v15, %v1473_v14 }
 0x179   :  { %v282_v33 = vadd.f32 %v279_v30, %v278_v18 }
 0x17e   :  { %v1477_v28 = vpop.f32.mrf.mxu1 }
 0x17f   :  { %v280_v32 = vmul.f32 %v1477_v28, %v1477_v28  ;;  %v269_v34 = vadd.f32 %v268_v31, %v1477_v28 }
 0x181   :  { %v283_v37 = vadd.f32 %v282_v33, %v280_v32 }
 0x186   :  { %v265_v36 = vpop.f32.mrf.mxu1 }
 0x187   :  { %v270_v38 = vadd.f32 %v269_v34, %v265_v36  ;;  %v281_v39 = vmul.f32 %v265_v36, %v265_v36  ;;  %v1318_v34 = vld [vmem:[#allocation2 + $0xf0] sm:$0xff] }
 0x189   :  { %v271_v40 = vrot.slane %v270_v38, 4  ;;  %v284_v41 = vadd.f32 %v283_v37, %v281_v39  ;;  %v1317_v39 = vld [vmem:[#allocation2 + $0xe8] sm:$0xff] }
 0x18b   :  { %v272_v43 = vadd.f32 %v271_v40, %v270_v38  ;;  %v285_v44 = vrot.slane %v284_v41, 4 }
 0x18d   :  { %v273_v45 = vrot.slane %v272_v43, 2  ;;  %v286_v46 = vadd.f32 %v285_v44, %v284_v41 }
 0x18f   :  { %v274_v48 = vadd.f32 %v273_v45, %v272_v43  ;;  %v287_v50 = vrot.slane %v286_v46, 2 }
 0x191   :  { %v275_v51 = vrot.slane %v274_v48, 1  ;;  %v288_v52 = vadd.f32 %v287_v50, %v286_v46  ;;  %v1316_v46 = vld [vmem:[#allocation2 + $0xe0] sm:$0xff] }
 0x193   :  { %v276_v54 = vadd.f32 %v275_v51, %v274_v48  ;;  %v289_v55 = vrot.slane %v288_v52, 1 }
 0x195   :  { %v277_v57 = vmul.f32 %v276_v54, %v1459_v49  ;;  %v290_v58 = vadd.f32 %v289_v55, %v288_v52  ;;  %v1315_v52 = vld [vmem:[#allocation2 + $0xd8] sm:$0xff] }
 0x197   :  { %v291_v59 = vmul.f32 %v290_v58, %v1459_v49  ;;  %v292_v60 = vmul.f32 %v277_v57, %v277_v57 }
 0x199   :  { %v293_v62 = vsub.f32 %v291_v59, %v292_v60  ;;  %v1313_v60 = vld [vmem:[#allocation2 + $0xc8] sm:$0xff] }
 0x19b   :  { %v296_v63 = vadd.f32 1e-05, %v293_v62 }
 0x19d   :  { %1362 = vrsqrt.f32 %v296_v63  ;;  %vm303_vm5 = vweird.f32 %v296_v63 }
 0x1a3   :  { %v1363_v0 = vpop.eup %1362 }
 0x1a4   :  { %v298_v1 = vmul.f32 %v1363_v0, %v296_v63  ;;  %vm304_vm4 = vweird.f32 %v1363_v0 }
 0x1a5   :  { %vm305_vm6 = vmor %vm303_vm5, %vm304_vm4 }
 0x1a6   :  { %v299_v2 = vmul.f32 %v1363_v0, %v298_v1  ;;  %v1312_v1 = vld [vmem:[#allocation2 + $0xc0] sm:$0xff] }
 0x1a8   :  { %v300_v3 = vmul.f32 0.5, %v299_v2 }
 0x1aa   :  { %v301_v4 = vsub.f32 1.5, %v300_v3 }
 0x1ac   :  { %v302_v6 = vmul.f32 %v1363_v0, %v301_v4 }
 0x1ae   :  { %v306_v7 = vsel %vm305_vm6, %v1363_v0, %v302_v6  ;;  %vm1054_vm6 = vcmask 7168  }
 0x1af   :  { %v307_v8 = vmul.f32 %v306_v7, %v294_v5 }
 0x1b1   :  { %v308_v10 = vmul.f32 %v307_v8, %v277_v57  ;;  %v310_v11 = vperm.slane %v307_v8, 0  ;;  %v1314_v57 = vld [vmem:[#allocation2 + $0xd0] sm:$0xff] }
 0x1b3   :  { %v309_v12 = vsub.f32 %v295_v9, %v308_v10  ;;  %v311_v13 = vmul.f32 %v310_v11, %v1473_v14  ;;  %v312_v16 = vmul.f32 %v310_v11, %v1475_v15  ;;  %v314_v24 = vmul.f32 %v310_v11, %v265_v36  ;;  %v1319_v15 = vld [vmem:[#allocation2 + $0xf8] sm:$0xff]  ;;  %v436_v9 = vld [vmem:[%s1625_s2 + $0x4] sm:$0x1] }
 0x1b4   :  { %v313_v25 = vmul.f32 %v310_v11, %v1477_v28  ;;  %533 = vmatpush.bf16.msra.mxu3 %v1319_v15 }
 0x1b5   :  { %v315_v17 = vperm.slane %v309_v12, 0 }
 0x1b7   :  { %v316_v19 = vadd.f32 %v315_v17, %v311_v13  ;;  %v317_v20 = vadd.f32 %v315_v17, %v312_v16  ;;  %v318_v26 = vadd.f32 %v315_v17, %v313_v25  ;;  %v319_v27 = vadd.f32 %v315_v17, %v314_v24  ;;  %v437_v13 = vld [vmem:[%s1625_s2 + $0x5] sm:$0x1] }
 0x1b8   :  { %534 = vmatpush.bf16.msra.mxu3 %v1318_v34 }
 0x1b9   :  { %v320_v21 = vmax.f32 %v316_v19, 0.0  ;;  %v321_v22 = vmax.f32 %v317_v20, 0.0  ;;  %v322_v30 = vmax.f32 %v318_v26, 0.0  ;;  %v323_v29 = vmax.f32 %v319_v27, 0.0 }
 0x1bb   :  { %v324_v23 = vpack.c.bf16 %v321_v22, %v320_v21  ;;  %v325_v18 = vpack.c.bf16 %v323_v29, %v322_v30 }
 0x1bc   :  { %535 = vmatpush.bf16.msra.mxu3 %v1317_v39 }
 0x1bd   :  { %399 = vmatmul.bf16.vlgmr.msra.gmra.mxu2 %v324_v23 }
 0x1c0   :  { %536 = vmatpush.bf16.msra.mxu3 %v1316_v46 }
 0x1c4   :  { %537 = vmatpush.bf16.msra.mxu3 %v1315_v52 }
 0x1c8   :  { %538 = vmatpush.bf16.msra.mxu3 %v1314_v57 }
 0x1cc   :  { %539 = vmatpush.bf16.msra.mxu3 %v1313_v60 }
 0x1cd   :  { %404 = vmatmul.bf16.gmra.mxu2 %v325_v18 }
 0x1d0   :  { %540 = vmatpush.bf16.msra.mxu3 %v1312_v1 }
 0x240   :  { %v1499_v31 = vpop.f32.mrf.mxu2 }
 0x241   :  { %v420_v28 = vmul.f32 %v1499_v31, %v1499_v31 }
 0x248   :  { %v1501_v14 = vpop.f32.mrf.mxu2 }
 0x249   :  { %v421_v33 = vmul.f32 %v1501_v14, %v1501_v14  ;;  %v410_v35 = vadd.f32 %v1501_v14, %v1499_v31 }
 0x24b   :  { %v424_v37 = vadd.f32 %v421_v33, %v420_v28 }
 0x250   :  { %v1503_v32 = vpop.f32.mrf.mxu2 }
 0x251   :  { %v422_v36 = vmul.f32 %v1503_v32, %v1503_v32  ;;  %v411_v38 = vadd.f32 %v410_v35, %v1503_v32 }
 0x253   :  { %v425_v41 = vadd.f32 %v424_v37, %v422_v36 }
 0x258   :  { %v407_v40 = vpop.f32.mrf.mxu2 }
 0x259   :  { %v412_v42 = vadd.f32 %v411_v38, %v407_v40  ;;  %v423_v43 = vmul.f32 %v407_v40, %v407_v40  ;;  %v1326_v38 = vld [vmem:[#allocation2 + $0x130] sm:$0xff] }
 0x25b   :  { %v413_v44 = vrot.slane %v412_v42, 4  ;;  %v426_v45 = vadd.f32 %v425_v41, %v423_v43  ;;  %v1325_v43 = vld [vmem:[#allocation2 + $0x128] sm:$0xff] }
 0x25d   :  { %v414_v47 = vadd.f32 %v413_v44, %v412_v42  ;;  %v427_v48 = vrot.slane %v426_v45, 4 }
 0x25f   :  { %v415_v50 = vrot.slane %v414_v47, 2  ;;  %v428_v51 = vadd.f32 %v427_v48, %v426_v45 }
 0x261   :  { %v416_v53 = vadd.f32 %v415_v50, %v414_v47  ;;  %v429_v54 = vrot.slane %v428_v51, 2 }
 0x263   :  { %v417_v55 = vrot.slane %v416_v53, 1  ;;  %v430_v56 = vadd.f32 %v429_v54, %v428_v51  ;;  %v1324_v51 = vld [vmem:[#allocation2 + $0x120] sm:$0xff] }
 0x265   :  { %v418_v58 = vadd.f32 %v417_v55, %v416_v53  ;;  %v431_v59 = vrot.slane %v430_v56, 1 }
 0x267   :  { %v419_v61 = vmul.f32 %v418_v58, %v1459_v49  ;;  %v432_v62 = vadd.f32 %v431_v59, %v430_v56  ;;  %v1323_v56 = vld [vmem:[#allocation2 + $0x118] sm:$0xff] }
 0x269   :  { %v433_v63 = vmul.f32 %v432_v62, %v1459_v49  ;;  %v434_v0 = vmul.f32 %v419_v61, %v419_v61 }
 0x26b   :  { %v435_v2 = vsub.f32 %v433_v63, %v434_v0 }
 0x26d   :  { %v438_v3 = vadd.f32 1e-05, %v435_v2  ;;  %v1321_v2 = vld [vmem:[#allocation2 + $0x108] sm:$0xff] }
 0x26f   :  { %1364 = vrsqrt.f32 %v438_v3  ;;  %vm445_vm8 = vweird.f32 %v438_v3 }
 0x275   :  { %v1365_v4 = vpop.eup %1364 }
 0x276   :  { %v440_v5 = vmul.f32 %v1365_v4, %v438_v3  ;;  %vm446_vm7 = vweird.f32 %v1365_v4 }
 0x277   :  { %vm447_vm9 = vmor %vm445_vm8, %vm446_vm7 }
 0x278   :  { %v441_v6 = vmul.f32 %v1365_v4, %v440_v5  ;;  %v1320_v5 = vld [vmem:[#allocation2 + $0x100] sm:$0xff] }
 0x27a   :  { %v442_v7 = vmul.f32 0.5, %v441_v6 }
 0x27c   :  { %v443_v8 = vsub.f32 1.5, %v442_v7 }
 0x27e   :  { %v444_v10 = vmul.f32 %v1365_v4, %v443_v8 }
 0x280   :  { %v448_v11 = vsel %vm447_vm9, %v1365_v4, %v444_v10 }
 0x281   :  { %v449_v12 = vmul.f32 %v448_v11, %v436_v9 }
 0x283   :  { %v450_v16 = vmul.f32 %v449_v12, %v419_v61  ;;  %v452_v17 = vperm.slane %v449_v12, 0  ;;  %v1322_v61 = vld [vmem:[#allocation2 + $0x110] sm:$0xff] }
 0x285   :  { %v451_v19 = vsub.f32 %v437_v13, %v450_v16  ;;  %v453_v20 = vmul.f32 %v452_v17, %v1499_v31  ;;  %v454_v21 = vmul.f32 %v452_v17, %v1501_v14  ;;  %v456_v30 = vmul.f32 %v452_v17, %v407_v40  ;;  %v1327_v14 = vld [vmem:[#allocation2 + $0x138] sm:$0xff]  ;;  %v578_v13 = vld [vmem:[%s1625_s2 + $0x6] sm:$0x1] }
 0x286   :  { %v455_v29 = vmul.f32 %v452_v17, %v1503_v32  ;;  %1344 = vmatpush.bf16.msrb.mxu3 %v1327_v14  ;;  %675 = vmatpush.bf16.msrb.mxu0 %v1327_v14 }
 0x287   :  { %v457_v22 = vperm.slane %v451_v19, 0 }
 0x289   :  { %v458_v23 = vadd.f32 %v457_v22, %v453_v20  ;;  %v459_v24 = vadd.f32 %v457_v22, %v454_v21  ;;  %v460_v18 = vadd.f32 %v457_v22, %v455_v29  ;;  %v461_v15 = vadd.f32 %v457_v22, %v456_v30  ;;  %v579_v20 = vld [vmem:[%s1625_s2 + $0x7] sm:$0x1] }
 0x28a   :  { %1345 = vmatpush.bf16.msrb.mxu3 %v1326_v38  ;;  %676 = vmatpush.bf16.msrb.mxu0 %v1326_v38 }
 0x28b   :  { %v462_v25 = vmax.f32 %v458_v23, 0.0  ;;  %v463_v26 = vmax.f32 %v459_v24, 0.0  ;;  %v464_v33 = vmax.f32 %v460_v18, 0.0  ;;  %v465_v34 = vmax.f32 %v461_v15, 0.0 }
 0x28d   :  { %v466_v27 = vpack.c.bf16 %v463_v26, %v462_v25  ;;  %v467_v28 = vpack.c.bf16 %v465_v34, %v464_v33 }
 0x28e   :  { %1346 = vmatpush.bf16.msrb.mxu3 %v1325_v43  ;;  %677 = vmatpush.bf16.msrb.mxu0 %v1325_v43  ;;  %v1334_v43 = vld [vmem:[#allocation2 + $0x170] sm:$0xff] }
 0x28f   :  { %541 = vmatmul.bf16.vlgmr.msra.gmra.mxu3 %v466_v27 }
 0x292   :  { %1347 = vmatpush.bf16.msrb.mxu3 %v1324_v51  ;;  %678 = vmatpush.bf16.msrb.mxu0 %v1324_v51 }
 0x296   :  { %1348 = vmatpush.bf16.msrb.mxu3 %v1323_v56  ;;  %679 = vmatpush.bf16.msrb.mxu0 %v1323_v56 }
 0x29a   :  { %1349 = vmatpush.bf16.msrb.mxu3 %v1322_v61  ;;  %680 = vmatpush.bf16.msrb.mxu0 %v1322_v61 }
 0x29e   :  { %1350 = vmatpush.bf16.msrb.mxu3 %v1321_v2  ;;  %681 = vmatpush.bf16.msrb.mxu0 %v1321_v2 }
 0x29f   :  { %546 = vmatmul.bf16.gmra.mxu3 %v467_v28 }
 0x2a2   :  { %1351 = vmatpush.bf16.msrb.mxu3 %v1320_v5  ;;  %682 = vmatpush.bf16.msrb.mxu0 %v1320_v5 }
 0x312   :  { %v1525_v35 = vpop.f32.mrf.mxu3 }
 0x313   :  { %v562_v32 = vmul.f32 %v1525_v35, %v1525_v35 }
 0x31a   :  { %v1527_v31 = vpop.f32.mrf.mxu3 }
 0x31b   :  { %v563_v37 = vmul.f32 %v1527_v31, %v1527_v31  ;;  %v552_v39 = vadd.f32 %v1527_v31, %v1525_v35 }
 0x31d   :  { %v566_v41 = vadd.f32 %v563_v37, %v562_v32 }
 0x322   :  { %v1529_v36 = vpop.f32.mrf.mxu3 }
 0x323   :  { %v564_v40 = vmul.f32 %v1529_v36, %v1529_v36  ;;  %v553_v42 = vadd.f32 %v552_v39, %v1529_v36 }
 0x325   :  { %v567_v45 = vadd.f32 %v566_v41, %v564_v40  ;;  %v1335_v40 = vld [vmem:[#allocation2 + $0x178] sm:$0xff] }
 0x326   :  { %817 = vmatpush.bf16.msrb.mxu1 %v1335_v40 }
 0x32a   :  { %v549_v44 = vpop.f32.mrf.mxu3  ;;  %818 = vmatpush.bf16.msrb.mxu1 %v1334_v43 }
 0x32b   :  { %v554_v46 = vadd.f32 %v553_v42, %v549_v44  ;;  %v565_v47 = vmul.f32 %v549_v44, %v549_v44 }
 0x32d   :  { %v555_v48 = vrot.slane %v554_v46, 4  ;;  %v568_v50 = vadd.f32 %v567_v45, %v565_v47  ;;  %v1333_v47 = vld [vmem:[#allocation2 + $0x168] sm:$0xff] }
 0x32e   :  { %819 = vmatpush.bf16.msrb.mxu1 %v1333_v47 }
 0x32f   :  { %v556_v52 = vadd.f32 %v555_v48, %v554_v46  ;;  %v569_v53 = vrot.slane %v568_v50, 4 }
 0x331   :  { %v557_v54 = vrot.slane %v556_v52, 2  ;;  %v570_v55 = vadd.f32 %v569_v53, %v568_v50 }
 0x333   :  { %v558_v57 = vadd.f32 %v557_v54, %v556_v52  ;;  %v571_v58 = vrot.slane %v570_v55, 2 }
 0x335   :  { %v559_v59 = vrot.slane %v558_v57, 1  ;;  %v572_v60 = vadd.f32 %v571_v58, %v570_v55  ;;  %v1332_v55 = vld [vmem:[#allocation2 + $0x160] sm:$0xff] }
 0x336   :  { %820 = vmatpush.bf16.msrb.mxu1 %v1332_v55 }
 0x337   :  { %v560_v62 = vadd.f32 %v559_v59, %v558_v57  ;;  %v573_v63 = vrot.slane %v572_v60, 1 }
 0x339   :  { %v561_v0 = vmul.f32 %v560_v62, %v1459_v49  ;;  %v574_v1 = vadd.f32 %v573_v63, %v572_v60  ;;  %v1331_v60 = vld [vmem:[#allocation2 + $0x158] sm:$0xff] }
 0x33a   :  { %821 = vmatpush.bf16.msrb.mxu1 %v1331_v60 }
 0x33b   :  { %v575_v3 = vmul.f32 %v574_v1, %v1459_v49  ;;  %v576_v4 = vmul.f32 %v561_v0, %v561_v0  ;;  %v1330_v1 = vld [vmem:[#allocation2 + $0x150] sm:$0xff] }
 0x33d   :  { %v577_v6 = vsub.f32 %v575_v3, %v576_v4 }
 0x33e   :  { %822 = vmatpush.bf16.msrb.mxu1 %v1330_v1 }
 0x33f   :  { %v580_v7 = vadd.f32 1e-05, %v577_v6  ;;  %v1329_v6 = vld [vmem:[#allocation2 + $0x148] sm:$0xff] }
 0x341   :  { %1366 = vrsqrt.f32 %v580_v7  ;;  %vm587_vm11 = vweird.f32 %v580_v7 }
 0x342   :  { %823 = vmatpush.bf16.msrb.mxu1 %v1329_v6 }
 0x347   :  { %v1367_v8 = vpop.eup %1366 }
 0x348   :  { %v582_v9 = vmul.f32 %v1367_v8, %v580_v7  ;;  %vm588_vm10 = vweird.f32 %v1367_v8 }
 0x349   :  { %vm589_vm12 = vmor %vm587_vm11, %vm588_vm10 }
 0x34a   :  { %v583_v10 = vmul.f32 %v1367_v8, %v582_v9  ;;  %v1328_v9 = vld [vmem:[#allocation2 + $0x140] sm:$0xff] }
 0x34b   :  { %824 = vmatpush.bf16.msrb.mxu1 %v1328_v9 }
 0x34c   :  { %v584_v11 = vmul.f32 0.5, %v583_v10 }
 0x34e   :  { %v585_v12 = vsub.f32 1.5, %v584_v11 }
 0x350   :  { %v586_v16 = vmul.f32 %v1367_v8, %v585_v12 }
 0x352   :  { %v590_v17 = vsel %vm589_vm12, %v1367_v8, %v586_v16 }
 0x353   :  { %v591_v19 = vmul.f32 %v590_v17, %v578_v13 }
 0x355   :  { %v592_v21 = vmul.f32 %v591_v19, %v561_v0  ;;  %v594_v22 = vperm.slane %v591_v19, 0 }
 0x357   :  { %v593_v23 = vsub.f32 %v579_v20, %v592_v21  ;;  %v598_v24 = vmul.f32 %v594_v22, %v549_v44  ;;  %v595_v26 = vmul.f32 %v594_v22, %v1525_v35  ;;  %v596_v27 = vmul.f32 %v594_v22, %v1527_v31  ;;  %v720_v20 = vld [vmem:[%s1625_s2 + $0x8] sm:$0x1] }
 0x358   :  { %v597_v30 = vmul.f32 %v594_v22, %v1529_v36 }
 0x359   :  { %v599_v25 = vperm.slane %v593_v23, 0 }
 0x35b   :  { %v603_v29 = vadd.f32 %v599_v25, %v598_v24  ;;  %v600_v18 = vadd.f32 %v599_v25, %v595_v26  ;;  %v601_v15 = vadd.f32 %v599_v25, %v596_v27  ;;  %v602_v33 = vadd.f32 %v599_v25, %v597_v30  ;;  %v721_v24 = vld [vmem:[%s1625_s2 + $0x9] sm:$0x1] }
 0x35d   :  { %v604_v34 = vmax.f32 %v600_v18, 0.0  ;;  %v605_v28 = vmax.f32 %v601_v15, 0.0  ;;  %v606_v14 = vmax.f32 %v602_v33, 0.0  ;;  %v607_v37 = vmax.f32 %v603_v29, 0.0 }
 0x35f   :  { %v608_v38 = vpack.c.bf16 %v605_v28, %v604_v34  ;;  %v609_v32 = vpack.c.bf16 %v607_v37, %v606_v14 }
 0x361   :  { %683 = vmatmul.bf16.vlgmr.msrb.gmra.mxu0 %v608_v38  ;;  %688 = vmatmul.bf16.vlgmr.msrb.gmra.mxu3 %v609_v32 }
 0x3de   :  { %v1551_v39 = vpop.f32.mrf.mxu0 }
 0x3df   :  { %v704_v36 = vmul.f32 %v1551_v39, %v1551_v39 }
 0x3e4   :  { %v1553_v35 = vpop.f32.mrf.mxu3 }
 0x3e5   :  { %v706_v45 = vmul.f32 %v1553_v35, %v1553_v35 }
 0x3e6   :  { %v686_v31 = vpop.f32.mrf.mxu0 }
 0x3e7   :  { %v694_v41 = vadd.f32 %v686_v31, %v1551_v39  ;;  %v705_v42 = vmul.f32 %v686_v31, %v686_v31 }
 0x3e9   :  { %v708_v44 = vadd.f32 %v705_v42, %v704_v36  ;;  %v695_v46 = vadd.f32 %v694_v41, %v1553_v35 }
 0x3eb   :  { %v709_v52 = vadd.f32 %v708_v44, %v706_v45 }
 0x3ec   :  { %v691_v48 = vpop.f32.mrf.mxu3 }
 0x3ed   :  { %v696_v50 = vadd.f32 %v695_v46, %v691_v48  ;;  %v707_v51 = vmul.f32 %v691_v48, %v691_v48  ;;  %v1342_v46 = vld [vmem:[#allocation2 + $0x1b0] sm:$0xff] }
 0x3ef   :  { %v697_v53 = vrot.slane %v696_v50, 4  ;;  %v710_v54 = vadd.f32 %v709_v52, %v707_v51  ;;  %v1341_v52 = vld [vmem:[#allocation2 + $0x1a8] sm:$0xff] }
 0x3f1   :  { %v698_v56 = vadd.f32 %v697_v53, %v696_v50  ;;  %v711_v57 = vrot.slane %v710_v54, 4 }
 0x3f3   :  { %v699_v58 = vrot.slane %v698_v56, 2  ;;  %v712_v59 = vadd.f32 %v711_v57, %v710_v54 }
 0x3f5   :  { %v700_v61 = vadd.f32 %v699_v58, %v698_v56  ;;  %v713_v62 = vrot.slane %v712_v59, 2 }
 0x3f7   :  { %v701_v63 = vrot.slane %v700_v61, 1  ;;  %v714_v0 = vadd.f32 %v713_v62, %v712_v59  ;;  %v1340_v59 = vld [vmem:[#allocation2 + $0x1a0] sm:$0xff] }
 0x3f9   :  { %v702_v2 = vadd.f32 %v701_v63, %v700_v61  ;;  %v715_v3 = vrot.slane %v714_v0, 1 }
 0x3fb   :  { %v703_v4 = vmul.f32 %v702_v2, %v1459_v49  ;;  %v716_v5 = vadd.f32 %v715_v3, %v714_v0  ;;  %v1339_v0 = vld [vmem:[#allocation2 + $0x198] sm:$0xff] }
 0x3fd   :  { %v717_v7 = vmul.f32 %v716_v5, %v1459_v49  ;;  %v718_v8 = vmul.f32 %v703_v4, %v703_v4  ;;  %v1338_v5 = vld [vmem:[#allocation2 + $0x190] sm:$0xff] }
 0x3ff   :  { %v719_v10 = vsub.f32 %v717_v7, %v718_v8 }
 0x401   :  { %v722_v11 = vadd.f32 1e-05, %v719_v10  ;;  %v1337_v10 = vld [vmem:[#allocation2 + $0x188] sm:$0xff] }
 0x403   :  { %1368 = vrsqrt.f32 %v722_v11  ;;  %vm729_vm14 = vweird.f32 %v722_v11 }
 0x409   :  { %v1369_v12 = vpop.eup %1368 }
 0x40a   :  { %v724_v13 = vmul.f32 %v1369_v12, %v722_v11  ;;  %vm730_vm13 = vweird.f32 %v1369_v12 }
 0x40b   :  { %vm731_vm15 = vmor %vm729_vm14, %vm730_vm13 }
 0x40c   :  { %v725_v16 = vmul.f32 %v1369_v12, %v724_v13  ;;  %v1336_v13 = vld [vmem:[#allocation2 + $0x180] sm:$0xff] }
 0x40e   :  { %v726_v17 = vmul.f32 0.5, %v725_v16 }
 0x410   :  { %v727_v19 = vsub.f32 1.5, %v726_v17 }
 0x412   :  { %v728_v21 = vmul.f32 %v1369_v12, %v727_v19 }
 0x414   :  { %v732_v22 = vsel %vm731_vm15, %v1369_v12, %v728_v21 }
 0x415   :  { %v733_v23 = vmul.f32 %v732_v22, %v720_v20 }
 0x417   :  { %v734_v25 = vmul.f32 %v733_v23, %v703_v4  ;;  %v736_v26 = vperm.slane %v733_v23, 0 }
 0x419   :  { %v735_v27 = vsub.f32 %v721_v24, %v734_v25  ;;  %v737_v29 = vmul.f32 %v736_v26, %v1551_v39  ;;  %v738_v18 = vmul.f32 %v736_v26, %v686_v31  ;;  %v740_v37 = vmul.f32 %v736_v26, %v691_v48  ;;  %v1343_v39 = vld [vmem:[#allocation2 + $0x1b8] sm:$0xff]  ;;  %v862_v24 = vld [vmem:[%s1625_s2 + $0xa] sm:$0x1] }
 0x41a   :  { %v739_v38 = vmul.f32 %v736_v26, %v1553_v35  ;;  %959 = vmatpush.bf16.msrb.mxu2 %v1343_v39 }
 0x41b   :  { %v741_v30 = vperm.slane %v735_v27, 0 }
 0x41d   :  { %v742_v15 = vadd.f32 %v741_v30, %v737_v29  ;;  %v743_v33 = vadd.f32 %v741_v30, %v738_v18  ;;  %v745_v32 = vadd.f32 %v741_v30, %v740_v37  ;;  %v744_v40 = vadd.f32 %v741_v30, %v739_v38  ;;  %v863_v30 = vld [vmem:[%s1625_s2 + $0xb] sm:$0x1] }
 0x41e   :  { %960 = vmatpush.bf16.msrb.mxu2 %v1342_v46 }
 0x41f   :  { %v746_v34 = vmax.f32 %v742_v15, 0.0  ;;  %v747_v28 = vmax.f32 %v743_v33, 0.0  ;;  %v748_v36 = vmax.f32 %v744_v40, 0.0  ;;  %v749_v41 = vmax.f32 %v745_v32, 0.0 }
 0x421   :  { %v750_v14 = vpack.c.bf16 %v747_v28, %v746_v34  ;;  %v751_v42 = vpack.c.bf16 %v749_v41, %v748_v36 }
 0x422   :  { %961 = vmatpush.bf16.msrb.mxu2 %v1341_v52 }
 0x423   :  { %825 = vmatmul.bf16.vlgmr.msrb.gmra.mxu1 %v750_v14 }
 0x426   :  { %962 = vmatpush.bf16.msrb.mxu2 %v1340_v59 }
 0x42a   :  { %963 = vmatpush.bf16.msrb.mxu2 %v1339_v0 }
 0x42e   :  { %964 = vmatpush.bf16.msrb.mxu2 %v1338_v5 }
 0x432   :  { %965 = vmatpush.bf16.msrb.mxu2 %v1337_v10 }
 0x433   :  { %830 = vmatmul.bf16.gmra.mxu1 %v751_v42 }
 0x436   :  { %966 = vmatpush.bf16.msrb.mxu2 %v1336_v13 }
 0x4a0   :  { %v1571_v43 = vpop.f32.mrf.mxu1 }
 0x4a1   :  { %v846_v35 = vmul.f32 %v1571_v43, %v1571_v43 }
 0x4a8   :  { %v1573_v44 = vpop.f32.mrf.mxu1 }
 0x4a9   :  { %v847_v45 = vmul.f32 %v1573_v44, %v1573_v44  ;;  %v836_v47 = vadd.f32 %v1573_v44, %v1571_v43 }
 0x4ab   :  { %v850_v50 = vadd.f32 %v847_v45, %v846_v35 }
 0x4b0   :  { %v1575_v31 = vpop.f32.mrf.mxu1 }
 0x4b1   :  { %v848_v48 = vmul.f32 %v1575_v31, %v1575_v31  ;;  %v837_v51 = vadd.f32 %v836_v47, %v1575_v31 }
 0x4b3   :  { %v851_v54 = vadd.f32 %v850_v50, %v848_v48 }
 0x4b8   :  { %v833_v53 = vpop.f32.mrf.mxu1 }
 0x4b9   :  { %v838_v55 = vadd.f32 %v837_v51, %v833_v53  ;;  %v849_v56 = vmul.f32 %v833_v53, %v833_v53 }
 0x4bb   :  { %v839_v57 = vrot.slane %v838_v55, 4  ;;  %v852_v58 = vadd.f32 %v851_v54, %v849_v56 }
 0x4bd   :  { %v840_v60 = vadd.f32 %v839_v57, %v838_v55  ;;  %v853_v61 = vrot.slane %v852_v58, 4 }
 0x4bf   :  { %v841_v62 = vrot.slane %v840_v60, 2  ;;  %v854_v63 = vadd.f32 %v853_v61, %v852_v58 }
 0x4c1   :  { %v842_v1 = vadd.f32 %v841_v62, %v840_v60  ;;  %v855_v2 = vrot.slane %v854_v63, 2 }
 0x4c3   :  { %v843_v3 = vrot.slane %v842_v1, 1  ;;  %v856_v4 = vadd.f32 %v855_v2, %v854_v63 }
 0x4c5   :  { %v844_v6 = vadd.f32 %v843_v3, %v842_v1  ;;  %v857_v7 = vrot.slane %v856_v4, 1 }
 0x4c7   :  { %v845_v8 = vmul.f32 %v844_v6, %v1459_v49  ;;  %v858_v9 = vadd.f32 %v857_v7, %v856_v4 }
 0x4c9   :  { %v859_v11 = vmul.f32 %v858_v9, %v1459_v49  ;;  %v860_v12 = vmul.f32 %v845_v8, %v845_v8 }
 0x4cb   :  { %v861_v16 = vsub.f32 %v859_v11, %v860_v12 }
 0x4cd   :  { %v864_v17 = vadd.f32 1e-05, %v861_v16 }
 0x4cf   :  { %1370 = vrsqrt.f32 %v864_v17  ;;  %vm871_vm1 = vweird.f32 %v864_v17 }
 0x4d5   :  { %v1371_v19 = vpop.eup %1370 }
 0x4d6   :  { %v866_v20 = vmul.f32 %v1371_v19, %v864_v17  ;;  %vm872_vm0 = vweird.f32 %v1371_v19 }
 0x4d7   :  { %vm873_vm2 = vmor %vm871_vm1, %vm872_vm0 }
 0x4d8   :  { %v867_v21 = vmul.f32 %v1371_v19, %v866_v20  ;;  %v1004_v20 = vld [vmem:[%s1625_s2 + $0xc] sm:$0x1] }
 0x4da   :  { %v868_v22 = vmul.f32 0.5, %v867_v21 }
 0x4dc   :  { %v869_v23 = vsub.f32 1.5, %v868_v22 }
 0x4de   :  { %v870_v25 = vmul.f32 %v1371_v19, %v869_v23 }
 0x4e0   :  { %v874_v26 = vsel %vm873_vm2, %v1371_v19, %v870_v25 }
 0x4e1   :  { %v875_v27 = vmul.f32 %v874_v26, %v862_v24 }
 0x4e3   :  { %v876_v29 = vmul.f32 %v875_v27, %v845_v8  ;;  %v878_v18 = vperm.slane %v875_v27, 0 }
 0x4e5   :  { %v877_v15 = vsub.f32 %v863_v30, %v876_v29  ;;  %v879_v34 = vmul.f32 %v878_v18, %v1571_v43  ;;  %v880_v28 = vmul.f32 %v878_v18, %v1573_v44  ;;  %v882_v36 = vmul.f32 %v878_v18, %v833_v53 }
 0x4e6   :  { %v881_v41 = vmul.f32 %v878_v18, %v1575_v31 }
 0x4e7   :  { %v883_v33 = vperm.slane %v877_v15, 0  ;;  %v1356_v15 = vld [vmem:[%s1625_s2 + $0xe] ss:$0 sm:$0xff] }
 0x4e9   :  { %v884_v14 = vadd.f32 %v883_v33, %v879_v34  ;;  %v885_v37 = vadd.f32 %v883_v33, %v880_v28  ;;  %v887_v42 = vadd.f32 %v883_v33, %v882_v36  ;;  %v886_v39 = vadd.f32 %v883_v33, %v881_v41 }
 0x4eb   :  { %v888_v38 = vmax.f32 %v884_v14, 0.0  ;;  %v889_v32 = vmax.f32 %v885_v37, 0.0  ;;  %v890_v45 = vmax.f32 %v886_v39, 0.0  ;;  %v891_v46 = vmax.f32 %v887_v42, 0.0 }
 0x4ed   :  { %v892_v40 = vpack.c.bf16 %v889_v32, %v888_v38  ;;  %v893_v35 = vpack.c.bf16 %v891_v46, %v890_v45  ;;  %v1357_v46 = vld [vmem:[%s1625_s2 + $0xf] ss:$0 sm:$0xff] }
 0x4ef   :  { %967 = vmatmul.bf16.vlgmr.msrb.gmra.mxu2 %v892_v40 }
 0x4ff   :  { %972 = vmatmul.bf16.gmra.mxu2 %v893_v35 }
 0x572   :  { %v968_v47 = vpop.f32.mrf.mxu2 }
 0x573   :  { %v988_v44 = vmul.f32 %v968_v47, %v968_v47 }
 0x57a   :  { %v970_v48 = vpop.f32.mrf.mxu2 }
 0x57b   :  { %v989_v50 = vmul.f32 %v970_v48, %v970_v48  ;;  %v978_v51 = vadd.f32 %v970_v48, %v968_v47 }
 0x57d   :  { %v992_v54 = vadd.f32 %v989_v50, %v988_v44 }
 0x582   :  { %v973_v43 = vpop.f32.mrf.mxu2 }
 0x583   :  { %v990_v52 = vmul.f32 %v973_v43, %v973_v43  ;;  %v979_v55 = vadd.f32 %v978_v51, %v973_v43 }
 0x585   :  { %v993_v57 = vadd.f32 %v992_v54, %v990_v52 }
 0x58a   :  { %v975_v56 = vpop.f32.mrf.mxu2 }
 0x58b   :  { %v980_v53 = vadd.f32 %v979_v55, %v975_v56  ;;  %v991_v58 = vmul.f32 %v975_v56, %v975_v56 }
 0x58d   :  { %v981_v31 = vrot.slane %v980_v53, 4  ;;  %v994_v59 = vadd.f32 %v993_v57, %v991_v58 }
 0x58f   :  { %v982_v60 = vadd.f32 %v981_v31, %v980_v53  ;;  %v995_v61 = vrot.slane %v994_v59, 4 }
 0x591   :  { %v983_v62 = vrot.slane %v982_v60, 2  ;;  %v996_v63 = vadd.f32 %v995_v61, %v994_v59 }
 0x593   :  { %v984_v0 = vadd.f32 %v983_v62, %v982_v60  ;;  %v997_v1 = vrot.slane %v996_v63, 2 }
 0x595   :  { %v985_v2 = vrot.slane %v984_v0, 1  ;;  %v998_v3 = vadd.f32 %v997_v1, %v996_v63 }
 0x597   :  { %v986_v4 = vadd.f32 %v985_v2, %v984_v0  ;;  %v999_v5 = vrot.slane %v998_v3, 1 }
 0x599   :  { %v987_v6 = vmul.f32 %v986_v4, %v1459_v49  ;;  %v1000_v7 = vadd.f32 %v999_v5, %v998_v3 }
 0x59b   :  { %v1001_v8 = vmul.f32 %v1000_v7, %v1459_v49  ;;  %v1002_v9 = vmul.f32 %v987_v6, %v987_v6  ;;  %v1005_v49 = vld [vmem:[%s1625_s2 + $0xd] sm:$0x1] }
 0x59d   :  { %v1003_v10 = vsub.f32 %v1001_v8, %v1002_v9 }
 0x59f   :  { %v1006_v11 = vadd.f32 1e-05, %v1003_v10 }
 0x5a1   :  { %1372 = vrsqrt.f32 %v1006_v11  ;;  %vm1013_vm4 = vweird.f32 %v1006_v11 }
 0x5a7   :  { %v1373_v12 = vpop.eup %1372 }
 0x5a8   :  { %v1008_v13 = vmul.f32 %v1373_v12, %v1006_v11  ;;  %vm1014_vm3 = vweird.f32 %v1373_v12 }
 0x5a9   :  { %vm1015_vm5 = vmor %vm1013_vm4, %vm1014_vm3 }
 0x5aa   :  { %v1009_v16 = vmul.f32 %v1373_v12, %v1008_v13 }
 0x5ac   :  { %v1010_v17 = vmul.f32 0.5, %v1009_v16 }
 0x5ae   :  { %v1011_v19 = vsub.f32 1.5, %v1010_v17 }
 0x5b0   :  { %v1012_v21 = vmul.f32 %v1373_v12, %v1011_v19 }
 0x5b2   :  { %v1016_v22 = vsel %vm1015_vm5, %v1373_v12, %v1012_v21 }
 0x5b3   :  { %v1017_v23 = vmul.f32 %v1016_v22, %v1004_v20 }
 0x5b5   :  { %v1018_v24 = vmul.f32 %v1017_v23, %v987_v6  ;;  %v1020_v25 = vperm.slane %v1017_v23, 0 }
 0x5b7   :  { %v1019_v26 = vsub.f32 %v1005_v49, %v1018_v24  ;;  %v1023_v30 = vmul.f32 %v1020_v25, %v973_v43  ;;  %v1021_v29 = vmul.f32 %v1020_v25, %v968_v47  ;;  %v1024_v34 = vmul.f32 %v1020_v25, %v975_v56 }
 0x5b8   :  { %v1022_v37 = vmul.f32 %v1020_v25, %v970_v48 }
 0x5b9   :  { %v1025_v27 = vperm.slane %v1019_v26, 0 }
 0x5bb   :  { %v1028_v18 = vadd.f32 %v1025_v27, %v1023_v30  ;;  %v1026_v33 = vadd.f32 %v1025_v27, %v1021_v29  ;;  %v1029_v38 = vadd.f32 %v1025_v27, %v1024_v34  ;;  %v1027_v36 = vadd.f32 %v1025_v27, %v1022_v37 }
 0x5bd   :  { %v1032_v28 = vmax.f32 %v1028_v18, 0.0  ;;  %v1030_v14 = vmax.f32 %v1026_v33, 0.0  ;;  %v1033_v41 = vmax.f32 %v1029_v38, 0.0  ;;  %v1031_v42 = vmax.f32 %v1027_v36, 0.0 }
 0x5bf   :  { %v1039_v32 = vmul.f32 %v1356_v15, %v1032_v28  ;;  %v1037_v40 = vmul.f32 %v1356_v15, %v1030_v14  ;;  %v1040_v39 = vmul.f32 %v1356_v15, %v1033_v41  ;;  %v1038_v45 = vmul.f32 %v1356_v15, %v1031_v42 }
 0x5c1   :  { %1045 = vadd.xlane.f32.xlu1 %v1039_v32  ;;  %1041 = vadd.xlane.f32.xlu0 %v1037_v40 }
 0x5c9   :  { %1047 = vadd.xlane.f32.xlu1 %v1040_v39  ;;  %1043 = vadd.xlane.f32.xlu0 %v1038_v45 }
 0x634   :  { %v1046_v35 = vpop.xlane.xlu1 %1045  ;;  %v1042_v47 = vpop.xlane.xlu0 %1041 }
 0x635   :  { %v1052_v48 = vadd.f32 %v1357_v46, %v1046_v35  ;;  %v1050_v43 = vadd.f32 %v1357_v46, %v1042_v47 }
 0x637   :  { %1057 = vst.msk [vmem:[%s1626_s3 + $0x10] sm:$0xff] %vm1054_vm6, %v1052_v48 }
 0x638   :  { %1055 = vst.msk [vmem:[%s1626_s3] sm:$0xff] %vm1054_vm6, %v1050_v43 }
 0x63c   :  { %v1048_v50 = vpop.xlane.xlu1 %1047  ;;  %v1044_v44 = vpop.xlane.xlu0 %1043 }
 0x63d   :  { %v1053_v51 = vadd.f32 %v1357_v46, %v1048_v50  ;;  %v1051_v52 = vadd.f32 %v1357_v46, %v1044_v44 }
 0x63f   :  { %1058 = vst.msk [vmem:[%s1626_s3 + $0x18] sm:$0xff] %vm1054_vm6, %v1053_v51 }
 0x640   :  { %1056 = vst.msk [vmem:[%s1626_s3 + $0x8] sm:$0xff] %vm1054_vm6, %v1051_v52 }
 0x641   :  { %1063 = vsyncpa [#allocation3], 1 }

</bundles_post_ra>
